<compile_context>
chip_gen: v5e
topology: v5e:2x2
jax: 0.10.0
libtpu: 0.0.40
codegen_flags: <defaults>
</compile_context>

<pallas_src>
import functools

import numpy as np

import jax
import jax.numpy as jnp
from jax.experimental import pallas as pl
from jax.experimental.pallas import tpu as pltpu

BN_EPS = 1e-5
LANE = 128      # lane width: feature dims padded to multiples of this
SUBLANE = 8     # f32 sublane width: batch tiles are multiples of this


def _round_up(n, m):
    return ((n + m - 1) // m) * m


# ----------------------------------------------------------------------------
# Chip capability (cached once): bf16 elementwise is native on v6e/v7x only.
# ----------------------------------------------------------------------------
_BF16_ACTS_CACHE = None


def _bf16_acts_supported():
    global _BF16_ACTS_CACHE
    if _BF16_ACTS_CACHE is None:
        kind = ""
        devs = jax.devices()
        if devs:
            kind = (getattr(devs[0], "device_kind", "") or "").lower()
        # v5e and older have no bf16 VPU/EUP; keep f32 elementwise there.
        _BF16_ACTS_CACHE = ("v6" in kind) or ("v7" in kind)
    return _BF16_ACTS_CACHE


# ----------------------------------------------------------------------------
# Kernel: fused MLP, all layers in one pallas_call, batch-tiled grid
# ----------------------------------------------------------------------------
def _make_decoder_kernel(n_layers, z_dim, bf16_acts):
    """(matmul + bias + ReLU) * (n_layers-1) then matmul + bias + sigmoid.

    BatchNorm is already folded into weights/biases.  Weights are bf16 (MXU,
    f32 accumulate); biases and the final sigmoid are f32.  Inter-layer
    activations are bf16 on chips with a bf16 VPU, f32 otherwise.
    """

    def kernel(x_ref, w_ref, b_ref, out_ref):
        # x_ref: (tb, z_dim) f32; w_ref: (L, D, D) bf16; b_ref: (L, 1, D) f32
        h = x_ref[...].astype(jnp.bfloat16)
        for li in range(n_layers):
            if li == 0:
                # Only the first z_dim rows of w[0] can contribute.
                w = w_ref[0][:z_dim, :]
            else:
                w = w_ref[li]
            y = jnp.dot(h, w, preferred_element_type=jnp.float32) + b_ref[li]
            if li < n_layers - 1:
                if bf16_acts:
                    h = jnp.maximum(y.astype(jnp.bfloat16), 0)   # bf16 VPU
                else:
                    h = jnp.maximum(y, 0.0).astype(jnp.bfloat16)  # f32 VPU (v5e)
            else:
                h = jax.nn.sigmoid(y)                             # f32 EUP
        out_ref[...] = h.astype(out_ref.dtype)

    return kernel


# ----------------------------------------------------------------------------
# Parameter construction / preparation
# ----------------------------------------------------------------------------
def init_decoder_params(key, z_dim, hidden_dims, output_dim):
    """Deterministic synthetic parameters matching the PyTorch module's shapes.

    hidden_dims is reversed (the module calls hidden_dims.reverse()).
    Weights are stored transposed vs. PyTorch: (in_features, out_features).
    Returns (layer_kinds, flat_raw_param_list) in f32.
    """
    h = list(reversed(hidden_dims))
    dims = [z_dim] + h + [output_dim]
    n_layers = len(dims) - 1

    layer_kinds = []
    params = []
    for li in range(n_layers):
        d_in, d_out = dims[li], dims[li + 1]
        key, kw, kb, kg, kbe, km, kv = jax.random.split(key, 7)
        w = jax.random.normal(kw, (d_in, d_out), jnp.float32) * 0.1
        b = jax.random.normal(kb, (1, d_out), jnp.float32) * 0.1
        params += [w, b]
        if li == 0:
            layer_kinds.append("relu")
        elif li == n_layers - 1:
            layer_kinds.append("sigmoid")
        else:
            layer_kinds.append("bn_relu")
            gamma = 1.0 + 0.1 * jax.random.normal(kg, (1, d_out), jnp.float32)
            beta = 0.1 * jax.random.normal(kbe, (1, d_out), jnp.float32)
            mean = 0.1 * jax.random.normal(km, (1, d_out), jnp.float32)
            var = 1.0 + 0.1 * jax.random.uniform(kv, (1, d_out), jnp.float32)
            params += [gamma, beta, mean, var]
    return tuple(layer_kinds), params


def fold_and_pad_params(raw_params, layer_kinds, eps=BN_EPS, lane=LANE):
    """Fold eval-mode BN into the Linears, zero-pad every feature dim to one
    common lane-aligned width D, and stack into two arrays:
      w_stack: (L, D, D) bf16,  b_stack: (L, 1, D) f32.
    Zero-padded rows/cols contribute exactly zero, so the transform is exact
    (the only precision loss is the bf16 weight cast)."""
    weights, biases = [], []
    idx = 0
    for kind in layer_kinds:
        w = raw_params[idx]
        b = raw_params[idx + 1]
        idx += 2
        if kind == "bn_relu":
            gamma, beta, mean, var = raw_params[idx:idx + 4]
            idx += 4
            scale = gamma * jax.lax.rsqrt(var + eps)     # (1, d_out) f32
            w = w * scale                                # scale each column
            b = (b - mean) * scale + beta
        weights.append(w)
        biases.append(b)

    d_max = max(d for w in weights for d in w.shape)
    D = _round_up(d_max, lane)

    w_stack = jnp.stack([
        jnp.pad(w, ((0, D - w.shape[0]), (0, D - w.shape[1]))) for w in weights
    ]).astype(jnp.bfloat16)
    b_stack = jnp.stack([
        jnp.pad(b, ((0, 0), (0, D - b.shape[1]))) for b in biases
    ]).astype(jnp.float32)
    return w_stack, b_stack


# ----------------------------------------------------------------------------
# Wrapper
# ----------------------------------------------------------------------------
def _choose_tb(B, z_dim, D, n_layers, out_itemsize,
               vmem_budget=24 << 20, cap=512):
    """Batch tile.  Small B -> a single grid step (round up to sublane).
    Large B -> 128-aligned tile (prefer 256-512) under a VMEM budget that
    includes double-buffered I/O blocks and per-layer intermediates."""
    B8 = _round_up(B, SUBLANE)
    if B8 <= cap:
        return B8                                   # one grid step

    def act_bytes(tb):
        io = 2 * tb * z_dim * 4 + 2 * tb * D * out_itemsize   # dbl-buffered x/out
        inter = n_layers * tb * D * 4                          # layer intermediates
        return io + inter

    tb = cap
    while tb > LANE and act_bytes(tb) > vmem_budget:
        tb -= LANE
    return max(LANE, tb)


@functools.partial(
    jax.jit, static_argnames=("output_dim", "tb", "bf16_acts", "out_dtype"))
def _decoder_forward_impl(x, w_stack, b_stack, output_dim, tb, bf16_acts,
                          out_dtype):
    n_layers, D, _ = w_stack.shape
    B, z_dim = x.shape
    out_itemsize = np.dtype(out_dtype).itemsize

    if tb is None:
        tb = _choose_tb(B, z_dim, D, n_layers, out_itemsize)
    grid = pl.cdiv(B, tb)

    # Keep the number of batch tiles even when there are several, so v7x's two
    # TensorCores get balanced work under dimension_semantics=("parallel",).
    if grid > 2 and grid % 2 == 1:
        tb2 = _round_up(pl.cdiv(B, grid + 1), SUBLANE)
        if tb2 >= SUBLANE and pl.cdiv(B, tb2) % 2 == 0:
            tb = tb2
            grid = pl.cdiv(B, tb)

    b_pad = grid * tb
    if b_pad > B:                     # remainder rows: padded, sliced off below
        x = jnp.pad(x, ((0, b_pad - B), (0, 0)))

    # x / out are batch-tiled; stacked params use one grid-invariant block each
    # (fetched once, not re-DMA'd per step).
    in_specs = [
        pl.BlockSpec((tb, z_dim), lambda i: (i, 0)),
        pl.BlockSpec(w_stack.shape, lambda i: (0, 0, 0)),
        pl.BlockSpec(b_stack.shape, lambda i: (0, 0, 0)),
    ]
    out_spec = pl.BlockSpec((tb, D), lambda i: (i, 0))

    # Honest VMEM estimate: params (double-buffered), I/O blocks, per-layer
    # intermediates; capped at 64 MiB (v7x per-TC VMEM).
    param_bytes = (w_stack.size * w_stack.dtype.itemsize
                   + b_stack.size * b_stack.dtype.itemsize)
    io_bytes = tb * z_dim * 4 + tb * D * out_itemsize
    inter_bytes = n_layers * tb * D * 4
    vmem_limit = int(min(64 << 20,
                         max(16 << 20,
                             2 * (param_bytes + io_bytes) + inter_bytes
                             + (2 << 20))))

    out = pl.pallas_call(
        _make_decoder_kernel(n_layers, z_dim, bf16_acts),
        out_shape=jax.ShapeDtypeStruct((b_pad, D), out_dtype),
        grid_spec=pltpu.PrefetchScalarGridSpec(
            num_scalar_prefetch=0,
            grid=(grid,),
            in_specs=in_specs,
            out_specs=out_spec,
        ),
        compiler_params=pltpu.CompilerParams(
            dimension_semantics=("parallel",),
            vmem_limit_bytes=vmem_limit,
        ),
    )(x, w_stack, b_stack)

    if b_pad > B or D > output_dim:
        out = out[:B, :output_dim]
    return out


def decoder_forward(x, w_stack, b_stack, output_dim, tb=None,
                    out_dtype=jnp.bfloat16):
    """Decoder forward.  Output is bf16 by default (sigmoid range [0,1]) to
    halve output HBM traffic; pass out_dtype=jnp.float32 if f32 is needed."""
    return _decoder_forward_impl(x, w_stack, b_stack, output_dim, tb,
                                 _bf16_acts_supported(), out_dtype)


# ----------------------------------------------------------------------------
# Pure-JAX reference (original, unfolded semantics: Linear + eval-BN + act)
# ----------------------------------------------------------------------------
def decoder_reference(x, raw_params, layer_kinds, eps=BN_EPS):
    h = x
    idx = 0
    for kind in layer_kinds:
        w, b = raw_params[idx], raw_params[idx + 1]
        idx += 2
        h = h @ w + b
        if kind == "bn_relu":
            gamma, beta, mean, var = raw_params[idx:idx + 4]
            idx += 4
            h = (h - mean) / jnp.sqrt(var + eps) * gamma + beta
            h = jnp.maximum(h, 0.0)
        elif kind == "relu":
            h = jnp.maximum(h, 0.0)
        else:
            h = jax.nn.sigmoid(h)
    return h


if __name__ == "__main__":
    # Small shapes consistent with the module's forward: x is (batch, z_dim).
    B = 40
    z_dim = 16
    hidden_dims = [64, 32]    # module reverses in place -> [32, 64]
    output_dim = 128

    key = jax.random.PRNGKey(0)
    key, kx = jax.random.split(key)
    x = jax.random.normal(kx, (B, z_dim), jnp.float32)

    layer_kinds, raw_params = init_decoder_params(key, z_dim, hidden_dims,
                                                  output_dim)
    w_stack, b_stack = fold_and_pad_params(raw_params, layer_kinds)

    # tb=None -> single grid step (tb = round_up(B, 8) = 40), no padded tiles,
    # no wrapper-side pad/cast of x.
    out = decoder_forward(x, w_stack, b_stack, output_dim)
    out = jax.block_until_ready(out)

    ref = decoder_reference(x, raw_params, layer_kinds)
    assert out.shape == (B, output_dim), out.shape
    max_err = float(jnp.max(jnp.abs(out.astype(jnp.float32) - ref)))
    # bf16 weights at the MXU + bf16 output store vs. full-f32 reference.
    assert max_err < 3e-2, max_err
    print("KERNEL_OK")
</pallas_src>

<mosaic_0001>
module attributes {stable_mosaic.version = 11 : i64} {
  func.func @kernel(%arg0: i32, %arg1: memref<40x16xf32, #tpu.memory_space<vmem>>, %arg2: memref<3x128x128xbf16, #tpu.memory_space<vmem>>, %arg3: memref<3x1x128xf32, #tpu.memory_space<vmem>>, %arg4: memref<40x128xbf16, #tpu.memory_space<vmem>>) attributes {dimension_semantics = [#tpu.dimension_semantics<parallel>], iteration_bounds = array<i64: 1>, scalar_prefetch = 0 : i64, scratch_operands = 0 : i64, tpu.core_type = #tpu.core_type<tc>, window_params = [{transform_indices = @transform_0, window_bounds = array<i64: 40, 16>}, {pipeline_mode = #tpu.pipeline_mode<synchronous>, transform_indices = @transform_1, window_bounds = array<i64: 3, 128, 128>}, {pipeline_mode = #tpu.pipeline_mode<synchronous>, transform_indices = @transform_2, window_bounds = array<i64: 3, 1, 128>}, {transform_indices = @transform_3, window_bounds = array<i64: 40, 128>}]} {
    %c0 = arith.constant 0 : index
    %c0_0 = arith.constant 0 : index
    %0 = vector.load %arg1[%c0, %c0_0] : memref<40x16xf32, #tpu.memory_space<vmem>>, vector<40x16xf32>
    %1 = arith.truncf %0 : vector<40x16xf32> to vector<40x16xbf16>
    %c0_1 = arith.constant 0 : index
    %c0_2 = arith.constant 0 : index
    %c0_3 = arith.constant 0 : index
    %2 = vector.load %arg2[%c0_1, %c0_2, %c0_3] : memref<3x128x128xbf16, #tpu.memory_space<vmem>>, vector<1x128x128xbf16>
    %3 = vector.shape_cast %2 : vector<1x128x128xbf16> to vector<128x128xbf16>
    %4 = vector.extract_strided_slice %3 {offsets = [0, 0], sizes = [16, 128], strides = [1, 1]} : vector<128x128xbf16> to vector<16x128xbf16>
    %cst = arith.constant dense<0.000000e+00> : vector<40x128xf32>
    %5 = tpu.matmul %1, %4, %cst {dimension_numbers = #tpu.dot_dimension_numbers<[1], [0], [0], [1], [0, 0, 1, 1], [], []>} : vector<40x16xbf16>, vector<16x128xbf16>, vector<40x128xf32> -> vector<40x128xf32>
    %c0_4 = arith.constant 0 : index
    %c0_5 = arith.constant 0 : index
    %c0_6 = arith.constant 0 : index
    %6 = vector.load %arg3[%c0_4, %c0_5, %c0_6] : memref<3x1x128xf32, #tpu.memory_space<vmem>>, vector<1x1x128xf32>
    %7 = vector.shape_cast %6 : vector<1x1x128xf32> to vector<1x128xf32>
    %8 = vector.broadcast %7 : vector<1x128xf32> to vector<40x128xf32>
    %9 = arith.addf %5, %8 : vector<40x128xf32>
    %cst_7 = arith.constant 0.000000e+00 : f32
    %10 = vector.broadcast %cst_7 : f32 to vector<40x128xf32>
    %11 = arith.maximumf %9, %10 : vector<40x128xf32>
    %12 = arith.truncf %11 : vector<40x128xf32> to vector<40x128xbf16>
    %c1 = arith.constant 1 : index
    %c0_8 = arith.constant 0 : index
    %c0_9 = arith.constant 0 : index
    %13 = vector.load %arg2[%c1, %c0_8, %c0_9] : memref<3x128x128xbf16, #tpu.memory_space<vmem>>, vector<1x128x128xbf16>
    %14 = vector.shape_cast %13 : vector<1x128x128xbf16> to vector<128x128xbf16>
    %cst_10 = arith.constant dense<0.000000e+00> : vector<40x128xf32>
    %15 = tpu.matmul %12, %14, %cst_10 {dimension_numbers = #tpu.dot_dimension_numbers<[1], [0], [0], [1], [0, 0, 1, 1], [], []>} : vector<40x128xbf16>, vector<128x128xbf16>, vector<40x128xf32> -> vector<40x128xf32>
    %c1_11 = arith.constant 1 : index
    %c0_12 = arith.constant 0 : index
    %c0_13 = arith.constant 0 : index
    %16 = vector.load %arg3[%c1_11, %c0_12, %c0_13] : memref<3x1x128xf32, #tpu.memory_space<vmem>>, vector<1x1x128xf32>
    %17 = vector.shape_cast %16 : vector<1x1x128xf32> to vector<1x128xf32>
    %18 = vector.broadcast %17 : vector<1x128xf32> to vector<40x128xf32>
    %19 = arith.addf %15, %18 : vector<40x128xf32>
    %cst_14 = arith.constant 0.000000e+00 : f32
    %20 = vector.broadcast %cst_14 : f32 to vector<40x128xf32>
    %21 = arith.maximumf %19, %20 : vector<40x128xf32>
    %22 = arith.truncf %21 : vector<40x128xf32> to vector<40x128xbf16>
    %c2 = arith.constant 2 : index
    %c0_15 = arith.constant 0 : index
    %c0_16 = arith.constant 0 : index
    %23 = vector.load %arg2[%c2, %c0_15, %c0_16] : memref<3x128x128xbf16, #tpu.memory_space<vmem>>, vector<1x128x128xbf16>
    %24 = vector.shape_cast %23 : vector<1x128x128xbf16> to vector<128x128xbf16>
    %cst_17 = arith.constant dense<0.000000e+00> : vector<40x128xf32>
    %25 = tpu.matmul %22, %24, %cst_17 {dimension_numbers = #tpu.dot_dimension_numbers<[1], [0], [0], [1], [0, 0, 1, 1], [], []>} : vector<40x128xbf16>, vector<128x128xbf16>, vector<40x128xf32> -> vector<40x128xf32>
    %c2_18 = arith.constant 2 : index
    %c0_19 = arith.constant 0 : index
    %c0_20 = arith.constant 0 : index
    %26 = vector.load %arg3[%c2_18, %c0_19, %c0_20] : memref<3x1x128xf32, #tpu.memory_space<vmem>>, vector<1x1x128xf32>
    %27 = vector.shape_cast %26 : vector<1x1x128xf32> to vector<1x128xf32>
    %28 = vector.broadcast %27 : vector<1x128xf32> to vector<40x128xf32>
    %29 = arith.addf %25, %28 : vector<40x128xf32>
    %30 = arith.negf %29 : vector<40x128xf32>
    %31 = math.exp %30 : vector<40x128xf32>
    %cst_21 = arith.constant 1.000000e+00 : f32
    %32 = vector.broadcast %cst_21 : f32 to vector<40x128xf32>
    %33 = arith.addf %32, %31 : vector<40x128xf32>
    %34 = arith.divf %32, %33 : vector<40x128xf32>
    %35 = arith.truncf %34 : vector<40x128xf32> to vector<40x128xbf16>
    %c0_22 = arith.constant 0 : index
    %c0_23 = arith.constant 0 : index
    %36 = vector.load %arg4[%c0_22, %c0_23] : memref<40x128xbf16, #tpu.memory_space<vmem>>, vector<40x128xbf16>
    tpu.vector_store %arg4[%c0_22, %c0_23], %35 {strides = array<i32>} : memref<40x128xbf16, #tpu.memory_space<vmem>>, vector<40x128xbf16>,
    return
  }
  func.func @transform_0(%arg0: i32) -> (i32, i32) {
    %c0_i32 = arith.constant 0 : i32
    %c0_i32_0 = arith.constant 0 : i32
    return %arg0, %c0_i32 : i32, i32
  }
  func.func @transform_1(%arg0: i32) -> (i32, i32, i32) {
    %c0_i32 = arith.constant 0 : i32
    %c0_i32_0 = arith.constant 0 : i32
    %c0_i32_1 = arith.constant 0 : i32
    %c0_i32_2 = arith.constant 0 : i32
    return %c0_i32, %c0_i32_0, %c0_i32_1 : i32, i32, i32
  }
  func.func @transform_2(%arg0: i32) -> (i32, i32, i32) {
    %c0_i32 = arith.constant 0 : i32
    %c0_i32_0 = arith.constant 0 : i32
    %c0_i32_1 = arith.constant 0 : i32
    %c0_i32_2 = arith.constant 0 : i32
    return %c0_i32, %c0_i32_0, %c0_i32_1 : i32, i32, i32
  }
  func.func @transform_3(%arg0: i32) -> (i32, i32) {
    %c0_i32 = arith.constant 0 : i32
    %c0_i32_0 = arith.constant 0 : i32
    return %arg0, %c0_i32 : i32, i32
  }
}

</mosaic_0001>

<bundles_post_ra>
// kernel: _decoder_forward_impl.1
= control target key start
LH: loop header
LB: loop body
LE: loop exit
PB: predicated region body
PF: predicated region fallthrough
CT: control target
= control target key end

     0   :  { %8 = vsyncpa [#allocation3], 0  ;;  %s667_s0 = inlined_call_operand.vmem [shape: f32[40,16], index: 0, kind: input, shape index: {}]   ;;  %s668_s1 = inlined_call_operand.hbm [shape: bf16[3,128,128], index: 1, kind: input, shape index: {}]   ;;  %s669_s2 = inlined_call_operand.vmem [shape: f32[3,1,128], index: 2, kind: input, shape index: {}]   ;;  %s670_s3 = inlined_call_operand.hbm [shape: bf16[40,128], index: 3, kind: output, shape index: {}]  }
   0x1   :  { %9 = vsyncpa [#allocation4], 0  ;;  %s16_s14 = sshll.u32 %s668_s1, 4  ;;  %s604_s15 = smov [#allocation2]   ;;  %s17_s14 = int_to_ptr.hbm [resolvable:$true] %s16_s14 }
   0x2   :  { %s18_s16 = sshll.u32 %s604_s15, 4  ;;  %s605_s17 = smov 64   ;;  %s19_s16 = int_to_ptr.vmem [resolvable:$true] %s18_s16 }
   0x3   :  { %s606_s18 = smov 4  }
   0x4   :  { %24 = dma.hbm_to_vmem [thread:$0]  %s17_s14, 3072, %s19_s16, [#allocation3], %s605_s17, %s605_s17, %s606_s18  }
   0x5   :  { %600 = dma.done.wait [#allocation3], 3072  }
   0x6   :  { %601 = vsyncadd [#allocation3], 4294964224  ;;  %v489_v0 = vld [vmem:[#allocation2] sm:$0xff]  ;;  %v33_v2 = vld [vmem:[%s667_s0 + $0x8] sm:$0xff]  ;;  %vm52_vm0 = vcmask 130048   ;;  %s398_s9 = sshll.u32 %s670_s3, 4  ;;  %s399_s9 = int_to_ptr.hbm [resolvable:$true] %s398_s9 }
   0x7   :  { %v32_v1 = vld [vmem:[%s667_s0] sm:$0xff]  ;;  %69 = vmatpush.bf16.msra.mxu0 %v489_v0  ;;  %v497_v4 = vld [vmem:[#allocation2 + $0x78] sm:$0xff]  ;;  %v496_v5 = vld [vmem:[#allocation2 + $0x70] sm:$0xff] }
   0x8   :  { %v37_v3 = vpack.c.bf16 %v33_v2, %v32_v1  ;;  %163 = vmatpush.bf16.msra.mxu1 %v497_v4  ;;  %517 = vmatpush.bf16.msra.mxu3 %v497_v4  ;;  %v495_v6 = vld [vmem:[#allocation2 + $0x68] sm:$0xff]  ;;  %v34_v7 = vld [vmem:[%s667_s0 + $0x10] sm:$0xff]  ;;  %v35_v8 = vld [vmem:[%s667_s0 + $0x18] sm:$0xff] }
   0x9   :  { %v494_v9 = vld [vmem:[#allocation2 + $0x60] sm:$0xff]  ;;  %v38_v10 = vpack.c.bf16 %v35_v8, %v34_v7  ;;  %v493_v13 = vld [vmem:[#allocation2 + $0x58] sm:$0xff]  ;;  %v492_v14 = vld [vmem:[#allocation2 + $0x50] sm:$0xff] }
   0xa   :  { %415 = vmatmul.msk.bf16.vlgmr.msra.gmra.mxu0 %vm52_vm0, %v37_v3  ;;  %v36_v11 = vld [vmem:[%s667_s0 + $0x20] sm:$0xff]  ;;  %v491_v15 = vld [vmem:[#allocation2 + $0x48] sm:$0xff]  ;;  %v505_v25 = vld [vmem:[#allocation2 + $0xb8] sm:$0xff] }
   0xb   :  { %v39_v12 = vpack.c.bf16 %v36_v11, %v36_v11  ;;  %v490_v16 = vld [vmem:[#allocation2 + $0x40] sm:$0xff]  ;;  %264 = vmatpush.bf16.msra.mxu2 %v505_v25  ;;  %v504_v27 = vld [vmem:[#allocation2 + $0xb0] sm:$0xff]  ;;  %v503_v28 = vld [vmem:[#allocation2 + $0xa8] sm:$0xff] }
   0xc   :  { %164 = vmatpush.bf16.msra.mxu1 %v496_v5  ;;  %518 = vmatpush.bf16.msra.mxu3 %v496_v5  ;;  %v529_v18 = vld [vmem:[%s669_s2] ss:$0 sm:$0xff]  ;;  %v501_v41 = vld [vmem:[#allocation2 + $0x98] sm:$0xff]  ;;  %v500_v42 = vld [vmem:[#allocation2 + $0x90] sm:$0xff] }
   0xd   :  { %v502_v32 = vld [vmem:[#allocation2 + $0xa0] sm:$0xff]  ;;  %v499_v43 = vld [vmem:[#allocation2 + $0x88] sm:$0xff] }
   0xe   :  { %v498_v44 = vld [vmem:[#allocation2 + $0x80] sm:$0xff] }
   0xf   :  { %265 = vmatpush.bf16.msra.mxu2 %v504_v27  ;;  %v530_v46 = vld [vmem:[%s669_s2 + $0x1] ss:$0 sm:$0xff]  ;;  %v531_v1 = vld [vmem:[%s669_s2 + $0x2] ss:$0 sm:$0xff]  ;;  %s607_s2 = smov [#allocation5]  }
  0x10   :  { %165 = vmatpush.bf16.msra.mxu1 %v495_v6  ;;  %519 = vmatpush.bf16.msra.mxu3 %v495_v6  ;;  %s396_s6 = sshll.u32 %s607_s2, 4  ;;  %s397_s6 = int_to_ptr.vmem [resolvable:$true] %s396_s6 }
  0x13   :  { %266 = vmatpush.bf16.msra.mxu2 %v503_v28 }
  0x14   :  { %166 = vmatpush.bf16.msra.mxu1 %v494_v9  ;;  %520 = vmatpush.bf16.msra.mxu3 %v494_v9 }
  0x17   :  { %267 = vmatpush.bf16.msra.mxu2 %v502_v32 }
  0x18   :  { %167 = vmatpush.bf16.msra.mxu1 %v493_v13  ;;  %521 = vmatpush.bf16.msra.mxu3 %v493_v13 }
  0x1a   :  { %416 = vmatmul.msk.bf16.gmra.mxu0 %vm52_vm0, %v38_v10 }
  0x1b   :  { %268 = vmatpush.bf16.msra.mxu2 %v501_v41 }
  0x1c   :  { %168 = vmatpush.bf16.msra.mxu1 %v492_v14  ;;  %522 = vmatpush.bf16.msra.mxu3 %v492_v14 }
  0x1f   :  { %269 = vmatpush.bf16.msra.mxu2 %v500_v42 }
  0x20   :  { %169 = vmatpush.bf16.msra.mxu1 %v491_v15  ;;  %523 = vmatpush.bf16.msra.mxu3 %v491_v15 }
  0x23   :  { %270 = vmatpush.bf16.msra.mxu2 %v499_v43 }
  0x24   :  { %170 = vmatpush.bf16.msra.mxu1 %v490_v16  ;;  %524 = vmatpush.bf16.msra.mxu3 %v490_v16 }
  0x27   :  { %271 = vmatpush.bf16.msra.mxu2 %v498_v44 }
  0x2a   :  { %417 = vmatmul.msk.bf16.gmra.mxu0 %vm52_vm0, %v39_v12 }
  0x87   :  { %v71_v17 = vpop.f32.mrf.mxu0 }
  0x88   :  { %v72_v19 = vadd.f32 %v529_v18, %v71_v17 }
  0x8a   :  { %v85_v22 = vmax.f32 %v72_v19, 0.0 }
  0x8f   :  { %v73_v20 = vpop.f32.mrf.mxu0 }
  0x90   :  { %v74_v21 = vadd.f32 %v529_v18, %v73_v20 }
  0x92   :  { %v86_v23 = vmax.f32 %v74_v21, 0.0 }
  0x94   :  { %v90_v24 = vpack.c.bf16 %v86_v23, %v85_v22 }
  0x96   :  { %171 = vmatmul.bf16.vlgmr.msra.gmra.mxu1 %v90_v24 }
  0x97   :  { %v76_v26 = vpop.f32.mrf.mxu0 }
  0x98   :  { %v77_v29 = vadd.f32 %v529_v18, %v76_v26 }
  0x9a   :  { %v87_v33 = vmax.f32 %v77_v29, 0.0 }
  0x9f   :  { %v78_v30 = vpop.f32.mrf.mxu0 }
  0xa0   :  { %v79_v31 = vadd.f32 %v529_v18, %v78_v30 }
  0xa2   :  { %v88_v34 = vmax.f32 %v79_v31, 0.0 }
  0xa4   :  { %v91_v35 = vpack.c.bf16 %v88_v34, %v87_v33 }
  0xa6   :  { %176 = vmatmul.bf16.vlgmr.msra.gmra.mxu3 %v91_v35 }
  0xa7   :  { %v81_v36 = vpop.f32.mrf.mxu0 }
  0xa8   :  { %v82_v37 = vadd.f32 %v529_v18, %v81_v36 }
  0xaa   :  { %v89_v38 = vmax.f32 %v82_v37, 0.0 }
  0xac   :  { %v92_v40 = vpack.c.bf16 %v89_v38, %v89_v38 }
  0xaf   :  { %v83_v39 = vpop.f32.mrf.mxu0 }
  0xb6   :  { %181 = vmatmul.bf16.gmra.mxu3 %v92_v40 }
 0x113   :  { %v172_v45 = vpop.f32.mrf.mxu1 }
 0x114   :  { %v173_v47 = vadd.f32 %v530_v46, %v172_v45 }
 0x116   :  { %v186_v50 = vmax.f32 %v173_v47, 0.0 }
 0x11b   :  { %v174_v48 = vpop.f32.mrf.mxu1 }
 0x11c   :  { %v175_v49 = vadd.f32 %v530_v46, %v174_v48 }
 0x11e   :  { %v187_v51 = vmax.f32 %v175_v49, 0.0 }
 0x120   :  { %v191_v52 = vpack.c.bf16 %v187_v51, %v186_v50 }
 0x122   :  { %272 = vmatmul.bf16.vlgmr.msra.gmra.mxu2 %v191_v52 }
 0x129   :  { %v177_v53 = vpop.f32.mrf.mxu3 }
 0x12a   :  { %v178_v54 = vadd.f32 %v530_v46, %v177_v53 }
 0x12c   :  { %v188_v57 = vmax.f32 %v178_v54, 0.0 }
 0x131   :  { %v179_v55 = vpop.f32.mrf.mxu3 }
 0x132   :  { %v180_v56 = vadd.f32 %v530_v46, %v179_v55 }
 0x134   :  { %v189_v58 = vmax.f32 %v180_v56, 0.0 }
 0x136   :  { %v192_v59 = vpack.c.bf16 %v189_v58, %v188_v57 }
 0x138   :  { %277 = vmatmul.bf16.gmra.mxu2 %v192_v59 }
 0x139   :  { %v182_v60 = vpop.f32.mrf.mxu3 }
 0x13a   :  { %v183_v61 = vadd.f32 %v530_v46, %v182_v60 }
 0x13c   :  { %v190_v62 = vmax.f32 %v183_v61, 0.0 }
 0x13e   :  { %v193_v0 = vpack.c.bf16 %v190_v62, %v190_v62 }
 0x141   :  { %v184_v63 = vpop.f32.mrf.mxu3 }
 0x148   :  { %282 = vmatmul.bf16.gmra.mxu2 %v193_v0 }
 0x1a5   :  { %v273_v2 = vpop.f32.mrf.mxu2 }
 0x1a6   :  { %v274_v3 = vadd.f32 %v531_v1, %v273_v2 }
 0x1a8   :  { %v484_v4 = vmul.f32 -1.442695, %v274_v3 }
 0x1aa   :  { %532 = vpow2.f32 %v484_v4 }
 0x1ad   :  { %v275_v5 = vpop.f32.mrf.mxu2 }
 0x1ae   :  { %v276_v6 = vadd.f32 %v531_v1, %v275_v5 }
 0x1b0   :  { %v533_v7 = vpop.eup %532  ;;  %v485_v8 = vmul.f32 -1.442695, %v276_v6 }
 0x1b1   :  { %v302_v9 = vadd.f32 1.0, %v533_v7 }
 0x1b2   :  { %534 = vpow2.f32 %v485_v8 }
 0x1b3   :  { %536 = vrcp.f32 %v302_v9  ;;  %vm312_vm2 = vweird.f32 %v302_v9  ;;  %v318_v25 = vand.u32 2147483648, %v302_v9  ;;  %v316_v27 = vand.u32 2147483647, %v302_v9 }
 0x1b5   :  { %v319_v35 = vor.u32 1.1754944e-38, %v318_v25  ;;  %vm317_vm7 = vcmp.eq.f32.partialorder %v316_v27, 8.507059e+37 }
 0x1b8   :  { %v535_v10 = vpop.eup %534 }
 0x1b9   :  { %v537_v11 = vpop.eup %536  ;;  %v303_v12 = vadd.f32 1.0, %v535_v10 }
 0x1ba   :  { %v308_v13 = vmul.f32 %v537_v11, %v302_v9  ;;  %vm313_vm1 = vweird.f32 %v537_v11 }
 0x1bb   :  { %538 = vrcp.f32 %v303_v12  ;;  %v278_v14 = vpop.f32.mrf.mxu2  ;;  %v333_v26 = vand.u32 2147483648, %v303_v12  ;;  %v331_v31 = vand.u32 2147483647, %v303_v12  ;;  %vm314_vm4 = vmor %vm312_vm2, %vm313_vm1  ;;  %vm327_vm5 = vweird.f32 %v303_v12 }
 0x1bc   :  { %v309_v15 = vsub.f32 1.0, %v308_v13  ;;  %v279_v16 = vadd.f32 %v531_v1, %v278_v14 }
 0x1bd   :  { %v334_v36 = vor.u32 1.1754944e-38, %v333_v26  ;;  %vm332_vm8 = vcmp.eq.f32.partialorder %v331_v31, 8.507059e+37 }
 0x1be   :  { %v486_v17 = vmul.f32 -1.442695, %v279_v16  ;;  %v310_v18 = vmul.f32 %v537_v11, %v309_v15 }
 0x1c0   :  { %540 = vpow2.f32 %v486_v17  ;;  %v311_v24 = vadd.f32 %v537_v11, %v310_v18 }
 0x1c1   :  { %v539_v19 = vpop.eup %538 }
 0x1c2   :  { %v323_v20 = vmul.f32 %v539_v19, %v303_v12  ;;  %vm328_vm3 = vweird.f32 %v539_v19  ;;  %v315_v33 = vsel %vm314_vm4, %v537_v11, %v311_v24 }
 0x1c3   :  { %v280_v21 = vpop.f32.mrf.mxu2  ;;  %vm329_vm6 = vmor %vm327_vm5, %vm328_vm3  ;;  %v320_v39 = vsel %vm317_vm7, %v319_v35, %v315_v33 }
 0x1c4   :  { %v324_v22 = vsub.f32 1.0, %v323_v20  ;;  %v281_v23 = vadd.f32 %v531_v1, %v280_v21 }
 0x1c6   :  { %v541_v28 = vpop.eup %540  ;;  %v325_v29 = vmul.f32 %v539_v19, %v324_v22  ;;  %v487_v30 = vmul.f32 -1.442695, %v281_v23 }
 0x1c7   :  { %v304_v32 = vadd.f32 1.0, %v541_v28 }
 0x1c8   :  { %542 = vpow2.f32 %v487_v30  ;;  %v326_v34 = vadd.f32 %v539_v19, %v325_v29 }
 0x1c9   :  { %544 = vrcp.f32 %v304_v32  ;;  %vm342_vm10 = vweird.f32 %v304_v32  ;;  %v348_v57 = vand.u32 2147483648, %v304_v32  ;;  %v346_v60 = vand.u32 2147483647, %v304_v32 }
 0x1ca   :  { %v330_v37 = vsel %vm329_vm6, %v539_v19, %v326_v34 }
 0x1cb   :  { %v283_v38 = vpop.f32.mrf.mxu2  ;;  %v335_v40 = vsel %vm332_vm8, %v334_v36, %v330_v37  ;;  %vm347_vm15 = vcmp.eq.f32.partialorder %v346_v60, 8.507059e+37 }
 0x1cc   :  { %v284_v41 = vadd.f32 %v531_v1, %v283_v38  ;;  %v509_v42 = vpack.c.bf16 %v335_v40, %v320_v39  ;;  %v349_v1 = vor.u32 1.1754944e-38, %v348_v57 }
 0x1ce   :  { %v543_v43 = vpop.eup %542  ;;  %v488_v44 = vmul.f32 -1.442695, %v284_v41  ;;  %510 = vst [vmem:[#allocation5] sm:$0xff] %v509_v42  }
 0x1cf   :  { %v545_v45 = vpop.eup %544  ;;  %v305_v46 = vadd.f32 1.0, %v543_v43 }
 0x1d0   :  { %v338_v47 = vmul.f32 %v545_v45, %v304_v32  ;;  %546 = vpow2.f32 %v488_v44  ;;  %vm343_vm9 = vweird.f32 %v545_v45 }
 0x1d1   :  { %548 = vrcp.f32 %v305_v46  ;;  %v363_v58 = vand.u32 2147483648, %v305_v46  ;;  %v361_v61 = vand.u32 2147483647, %v305_v46  ;;  %vm344_vm12 = vmor %vm342_vm10, %vm343_vm9  ;;  %vm357_vm13 = vweird.f32 %v305_v46 }
 0x1d2   :  { %v339_v48 = vsub.f32 1.0, %v338_v47 }
 0x1d3   :  { %v285_v49 = vpop.f32.mrf.mxu2  ;;  %v364_v2 = vor.u32 1.1754944e-38, %v363_v58  ;;  %vm362_vm0 = vcmp.eq.f32.partialorder %v361_v61, 8.507059e+37 }
 0x1d4   :  { %v340_v51 = vmul.f32 %v545_v45, %v339_v48 }
 0x1d6   :  { %v547_v50 = vpop.eup %546  ;;  %v341_v56 = vadd.f32 %v545_v45, %v340_v51 }
 0x1d7   :  { %v549_v52 = vpop.eup %548  ;;  %v306_v53 = vadd.f32 1.0, %v547_v50 }
 0x1d8   :  { %v353_v54 = vmul.f32 %v549_v52, %v305_v46  ;;  %vm358_vm11 = vweird.f32 %v549_v52  ;;  %v345_v62 = vsel %vm344_vm12, %v545_v45, %v341_v56 }
 0x1d9   :  { %550 = vrcp.f32 %v306_v53  ;;  %vm359_vm14 = vmor %vm357_vm13, %vm358_vm11  ;;  %v350_v5 = vsel %vm347_vm15, %v349_v1, %v345_v62  ;;  %v378_v9 = vand.u32 2147483648, %v306_v53  ;;  %v376_v11 = vand.u32 2147483647, %v306_v53 }
 0x1da   :  { %v354_v55 = vsub.f32 1.0, %v353_v54  ;;  %vm372_vm2 = vweird.f32 %v306_v53 }
 0x1db   :  { %v379_v13 = vor.u32 1.1754944e-38, %v378_v9  ;;  %vm377_vm4 = vcmp.eq.f32.partialorder %v376_v11, 8.507059e+37 }
 0x1dc   :  { %v355_v59 = vmul.f32 %v549_v52, %v354_v55 }
 0x1de   :  { %v356_v63 = vadd.f32 %v549_v52, %v355_v59 }
 0x1df   :  { %v551_v0 = vpop.eup %550 }
 0x1e0   :  { %v368_v3 = vmul.f32 %v551_v0, %v306_v53  ;;  %v360_v4 = vsel %vm359_vm14, %v549_v52, %v356_v63  ;;  %vm373_vm1 = vweird.f32 %v551_v0 }
 0x1e1   :  { %v365_v6 = vsel %vm362_vm0, %v364_v2, %v360_v4  ;;  %vm374_vm3 = vmor %vm372_vm2, %vm373_vm1 }
 0x1e2   :  { %v369_v7 = vsub.f32 1.0, %v368_v3  ;;  %v514_v8 = vpack.c.bf16 %v365_v6, %v350_v5 }
 0x1e4   :  { %v370_v10 = vmul.f32 %v551_v0, %v369_v7  ;;  %516 = vst [vmem:[#allocation5 + $0x8] sm:$0xff] %v514_v8  }
 0x1e6   :  { %v371_v12 = vadd.f32 %v551_v0, %v370_v10 }
 0x1e8   :  { %v375_v14 = vsel %vm374_vm3, %v551_v0, %v371_v12 }
 0x1e9   :  { %v380_v15 = vsel %vm377_vm4, %v379_v13, %v375_v14 }
 0x1ea   :  { %v386_v16 = vpack.c.bf16 %v380_v15, %v380_v15 }
 0x1ec   :  { %391 = vst [vmem:[#allocation5 + $0x10] sm:$0xf] %v386_v16 }
 0x1ed   :  { %404 = dma.vmem_to_hbm [thread:$0]  %s397_s6, 320, %s399_s9, [#allocation4], %s605_s17, %s605_s17, %s606_s18  }
 0x1ee   :  { %602 = dma.done.wait [#allocation4], 320  }
 0x1ef   :  { %603 = vsyncadd [#allocation4], 4294966976 }
 0x1f0   :  { %409 = vsyncpa [#allocation3], 1 }
 0x1f1   :  { %410 = vsyncpa [#allocation4], 1 }

</bundles_post_ra>
